<compile_context>
chip_gen: v7x
topology: tpu7x:2x2x1
jax: 0.10.0
libtpu: 0.0.40
codegen_flags: <defaults>
</compile_context>

<pallas_src>
import functools

import jax
import jax.numpy as jnp
from jax.experimental import pallas as pl
from jax.experimental.pallas import tpu as pltpu


def _mc_classify_kernel(thr_ref, lev_ref, lev_hbm_ref, neg_ref, idx_ref,
                        halo_ref, halo_sem, *, R, tx):
    """Fused: negate -> single inside-compare -> rolled corners -> cube index.

    Layout: the volume is flattened to (R, R*R); x -> sublanes, (y, z) -> lanes
    so every access is lane-dense.  One grid step processes a tx-row x-slab.
    """
    i = pl.program_id(0)
    n = R * R

    # Kick off the one-row halo fetch: the next slab's first row, i.e. global
    # row (i+1)*tx.  For the last slab that row does not exist; we fetch row
    # R-1 instead — its contribution only lands in the x = R-1 halo of the
    # output, which marching-cubes never consumes ((R-1)^3 cubes).
    halo_row = jnp.minimum((i + 1) * tx, R - 1)
    halo_cp = pltpu.make_async_copy(
        lev_hbm_ref.at[pl.ds(halo_row, 1)], halo_ref, halo_sem)
    halo_cp.start()

    thr = thr_ref[0]
    neg = -lev_ref[...]                       # (tx, n): the -level field fed to mcubes
    neg_ref[...] = neg

    # "inside" mask (bit set <=> -level < threshold, strict <, same convention
    # as the reference implementation).
    a = (neg < thr).astype(jnp.int32)         # corners with dx = 0

    # dx = 1 mask: sublane-roll the slab's own mask up by one row (XLU slot)...
    if tx > 1:
        b = pltpu.roll(a, shift=tx - 1, axis=0)   # row r <- row (r+1) mod tx
    else:
        b = a
    # ...then patch the last slab row with the DMA'd halo row's mask.
    halo_cp.wait()
    halo_mask = ((-halo_ref[...]) < thr).astype(jnp.int32)       # (1, n)
    row_ids = jax.lax.broadcasted_iota(jnp.int32, (tx, n), 0)
    b = jnp.where(row_ids == tx - 1, jnp.broadcast_to(halo_mask, (tx, n)), b)

    # 2-bit packed corner pairs: three lane rolls instead of six.
    p = b | (a << 1)      # bit0 = dx=1 mask, bit1 = dx=0 mask
    q = a | (b << 1)      # bit0 = dx=0 mask, bit1 = dx=1 mask

    def yz(v, dy, dz):
        # Value at flattened lane l + dy*R + dz placed at lane l.  Wrap-around
        # garbage only lands in the y = R-1 / z = R-1 halo of the output.
        return pltpu.roll(v, shift=n - (dy * R + dz), axis=1)

    idx = (q                                 # corners 0 (0,0,0) and 1 (1,0,0)
           | (yz(p, 1, 0) << 2)              # corners 2 (1,1,0) and 3 (0,1,0)
           | (yz(q, 0, 1) << 4)              # corners 4 (0,0,1) and 5 (1,0,1)
           | (yz(p, 1, 1) << 6))             # corners 6 (1,1,1) and 7 (0,1,1)
    idx_ref[...] = idx.astype(jnp.uint8)


def _pick_slab_rows(R):
    """x-slab rows per grid step.

    * uint8 index output => sublane extent must be a multiple of 32 unless the
      block spans the full dimension, so tx is either R or a multiple of 32.
    * target ~3 MiB per f32 input block: big enough to amortize the ~0.35 us
      per-grid-step overhead, small enough that double-buffered i/o plus the
      in-kernel mask/roll temporaries stay well under the 48 MiB vmem limit
      requested below (itself under v7x's 64 MiB physical VMEM).
    * when R is tileable, force >= 2 grid steps so the "parallel" axis can
      shard across both v7x TensorCores.
    """
    if R % 32 != 0 or R < 64:
        return R                                   # single full-extent slab
    row_bytes = R * R * 4
    tx = max(32, ((3 << 20) // row_bytes) // 32 * 32)
    tx = min(tx, max(32, (R // 2) // 32 * 32))     # keep at least 2 slabs
    while R % tx:
        tx -= 32
    return max(tx, 32)


def _mc_pallas(lev2d, thr, *, R):
    n = R * R
    tx = _pick_slab_rows(R)
    grid = (R // tx,)

    kernel = functools.partial(_mc_classify_kernel, R=R, tx=tx)
    bytes_accessed = (R * n * 4) * 2 + R * n + grid[0] * n * 4   # in + neg + idx + halo

    return pl.pallas_call(
        kernel,
        out_shape=(
            jax.ShapeDtypeStruct((R, n), jnp.float32),   # -level
            jax.ShapeDtypeStruct((R, n), jnp.uint8),     # cube index
        ),
        grid_spec=pltpu.PrefetchScalarGridSpec(
            num_scalar_prefetch=0,
            grid=grid,
            in_specs=[
                pl.BlockSpec((1,), lambda i: (0,),
                             memory_space=pltpu.MemorySpace.SMEM),  # threshold
                pl.BlockSpec((tx, n), lambda i: (i, 0)),            # level slab
                pl.BlockSpec(memory_space=pl.ANY),                  # same field, HBM, halo DMA
            ],
            out_specs=(
                pl.BlockSpec((tx, n), lambda i: (i, 0)),            # -level
                pl.BlockSpec((tx, n), lambda i: (i, 0)),            # cube index (uint8)
            ),
            scratch_shapes=[
                pltpu.VMEM((1, n), jnp.float32),                    # halo row buffer
                pltpu.SemaphoreType.DMA(()),                        # halo DMA semaphore
            ],
        ),
        compiler_params=pltpu.CompilerParams(
            dimension_semantics=("parallel",),
            vmem_limit_bytes=48 * 1024 * 1024,
        ),
        cost_estimate=pl.CostEstimate(
            flops=16 * R * n, transcendentals=0, bytes_accessed=bytes_accessed),
    )(thr, lev2d, lev2d)


@functools.partial(jax.jit, static_argnames=("resolution",))
def _mc_forward_impl(level, threshold, *, resolution):
    R = resolution
    n = R * R
    lev2d = jnp.asarray(level).astype(jnp.float32).reshape(R, n)
    thr = jnp.asarray(threshold, dtype=jnp.float32).reshape(1)

    neg2d, idx2d = _mc_pallas(lev2d, thr, R=R)
    neg_level = neg2d.reshape(R, R, R)
    # Full (R,R,R) index; rows/planes at x=R-1, y=R-1, z=R-1 are a documented
    # halo (marching cubes only consumes the (R-1)^3 interior cubes).
    cube_index = idx2d.reshape(R, R, R)

    # grid_vertices(): depends only on the static resolution -> plain jnp,
    # constant-folded under jit.  Matches torch.linspace + meshgrid('ij') and
    # the verts/(R-1) normalization exactly.
    lin = jnp.linspace(0.0, 1.0, R, dtype=jnp.float32)
    gx, gy, gz = jnp.meshgrid(lin, lin, lin, indexing="ij")
    grid_verts = jnp.stack(
        [gx.reshape(-1), gy.reshape(-1), gz.reshape(-1)], axis=-1)

    return neg_level, cube_index, grid_verts


def marching_cube_forward(level, threshold=0.0, resolution=16):
    neg_level, cube_index, grid_verts = _mc_forward_impl(
        level, threshold, resolution=resolution)
    return {
        "neg_level": neg_level,      # the field handed to mcubes
        "cube_index": cube_index,    # per-voxel 8-bit MC case, (R,R,R) uint8 (halo at max coords)
        "grid_verts": grid_verts,    # normalized grid vertices in [0,1]^3
    }


if __name__ == "__main__":
    R = 16
    key = jax.random.PRNGKey(0)
    # deterministic synthetic level field (e.g. a noisy SDF-like volume)
    level = jax.random.normal(key, (R ** 3,), dtype=jnp.float32)

    out = marching_cube_forward(level, threshold=0.0, resolution=R)
    jax.block_until_ready(out)

    # --- lightweight correctness checks against plain JAX ---------------
    lev3 = level.reshape(R, R, R)
    neg_ref = -lev3
    assert jnp.allclose(out["neg_level"], neg_ref), "neg_level mismatch"

    corners = (
        neg_ref[:-1, :-1, :-1], neg_ref[1:, :-1, :-1],
        neg_ref[1:, 1:, :-1],   neg_ref[:-1, 1:, :-1],
        neg_ref[:-1, :-1, 1:],  neg_ref[1:, :-1, 1:],
        neg_ref[1:, 1:, 1:],    neg_ref[:-1, 1:, 1:],
    )
    idx_ref = sum(
        jnp.where(c < 0.0, jnp.int32(1 << b), jnp.int32(0))
        for b, c in enumerate(corners)
    )
    got = out["cube_index"][: R - 1, : R - 1, : R - 1].astype(jnp.int32)
    assert jnp.array_equal(got, idx_ref), "cube_index mismatch"

    lin = jnp.linspace(0.0, 1.0, R)
    x, y, z = jnp.meshgrid(lin, lin, lin, indexing="ij")
    verts_ref = jnp.stack([x.reshape(-1), y.reshape(-1), z.reshape(-1)], axis=-1)
    assert jnp.allclose(out["grid_verts"], verts_ref, atol=1e-6), "grid_verts mismatch"

    print("KERNEL_OK")
</pallas_src>

<mosaic_0001>
module attributes {stable_mosaic.version = 11 : i64} {
  func.func @_mc_classify_kernel(%arg0: i32, %arg1: memref<1xf32, #tpu.memory_space<smem>>, %arg2: memref<16x256xf32, #tpu.memory_space<vmem>>, %arg3: memref<16x256xf32, #tpu.memory_space<any>>, %arg4: memref<16x256xf32, #tpu.memory_space<vmem>>, %arg5: memref<16x256xi8, #tpu.memory_space<vmem>>, %arg6: memref<1x256xf32, #tpu.memory_space<vmem>>, %arg7: memref<!tpu.dma_semaphore, #tpu.memory_space<semaphore_mem>>) attributes {dimension_semantics = [#tpu.dimension_semantics<parallel>], iteration_bounds = array<i64: 1>, scalar_prefetch = 0 : i64, scratch_operands = 2 : i64, tpu.core_type = #tpu.core_type<tc>, window_params = [{transform_indices = @transform_0, window_bounds = array<i64: 1>}, {transform_indices = @transform_1, window_bounds = array<i64: 16, 256>}, {}, {transform_indices = @transform_3, window_bounds = array<i64: 16, 256>}, {transform_indices = @transform_4, window_bounds = array<i64: 16, 256>}]} {
    %c1_i32 = arith.constant 1 : i32
    %0 = arith.addi %arg0, %c1_i32 : i32
    %c16_i32 = arith.constant 16 : i32
    %1 = arith.muli %0, %c16_i32 : i32
    %c15_i32 = arith.constant 15 : i32
    %2 = arith.minsi %1, %c15_i32 : i32
    %c0_i32 = arith.constant 0 : i32
    %3 = tpu.memref_slice %arg3[%2, %c0_i32] : memref<16x256xf32, #tpu.memory_space<any>> -> memref<1x256xf32, #tpu.memory_space<any>>
    tpu.enqueue_dma source(%3 : memref<1x256xf32, #tpu.memory_space<any>>) target(%arg6 : memref<1x256xf32, #tpu.memory_space<vmem>>) target_semaphore(%arg7 : memref<!tpu.dma_semaphore, #tpu.memory_space<semaphore_mem>>)
    %c0 = arith.constant 0 : index
    %4 = memref.load %arg1[%c0] : memref<1xf32, #tpu.memory_space<smem>>
    %c0_0 = arith.constant 0 : index
    %c0_1 = arith.constant 0 : index
    %5 = vector.load %arg2[%c0_0, %c0_1] : memref<16x256xf32, #tpu.memory_space<vmem>>, vector<16x256xf32>
    %cst = arith.constant 0.000000e+00 : f32
    %6 = vector.broadcast %cst : f32 to vector<16x256xf32>
    %7 = arith.subf %6, %5 : vector<16x256xf32>
    %c0_2 = arith.constant 0 : index
    %c0_3 = arith.constant 0 : index
    %8 = vector.load %arg4[%c0_2, %c0_3] : memref<16x256xf32, #tpu.memory_space<vmem>>, vector<16x256xf32>
    tpu.vector_store %arg4[%c0_2, %c0_3], %7 {strides = array<i32>} : memref<16x256xf32, #tpu.memory_space<vmem>>, vector<16x256xf32>,
    %9 = vector.broadcast %4 : f32 to vector<16x256xf32>
    %10 = arith.cmpf olt, %7, %9 : vector<16x256xf32>
    %11 = arith.extui %10 : vector<16x256xi1> to vector<16x256xi32>
    %c15_i32_4 = arith.constant 15 : i32
    %12 = tpu.dynamic_rotate %11 by %c15_i32_4 dim 0 : vector<16x256xi32>, i32 -> vector<16x256xi32>
    %c0_i32_5 = arith.constant 0 : i32
    %13 = tpu.memref_slice %arg3[%2, %c0_i32_5] : memref<16x256xf32, #tpu.memory_space<any>> -> memref<1x256xf32, #tpu.memory_space<any>>
    tpu.wait_dma2 semaphore(%arg7 : memref<!tpu.dma_semaphore, #tpu.memory_space<semaphore_mem>>) src(%13 : memref<1x256xf32, #tpu.memory_space<any>>) dst(%arg6 : memref<1x256xf32, #tpu.memory_space<vmem>>)
    %c0_6 = arith.constant 0 : index
    %c0_7 = arith.constant 0 : index
    %14 = vector.load %arg6[%c0_6, %c0_7] : memref<1x256xf32, #tpu.memory_space<vmem>>, vector<1x256xf32>
    %cst_8 = arith.constant 0.000000e+00 : f32
    %15 = vector.broadcast %cst_8 : f32 to vector<1x256xf32>
    %16 = arith.subf %15, %14 : vector<1x256xf32>
    %17 = vector.broadcast %4 : f32 to vector<1x256xf32>
    %18 = arith.cmpf olt, %16, %17 : vector<1x256xf32>
    %19 = arith.extui %18 : vector<1x256xi1> to vector<1x256xi32>
    %20 = tpu.iota {dimensions = array<i32: 0>} : vector<16x256xi32>
    %c15_i32_9 = arith.constant 15 : i32
    %21 = vector.broadcast %c15_i32_9 : i32 to vector<16x256xi32>
    %22 = arith.cmpi eq, %20, %21 : vector<16x256xi32>
    %23 = vector.shape_cast %19 : vector<1x256xi32> to vector<1x256xi32>
    %24 = vector.broadcast %23 : vector<1x256xi32> to vector<16x256xi32>
    %25 = arith.select %22, %24, %12 : vector<16x256xi1>, vector<16x256xi32>
    %c1_i32_10 = arith.constant 1 : i32
    %26 = vector.broadcast %c1_i32_10 : i32 to vector<16x256xi32>
    %27 = arith.shli %11, %26 : vector<16x256xi32>
    %28 = arith.ori %25, %27 : vector<16x256xi32>
    %c1_i32_11 = arith.constant 1 : i32
    %29 = vector.broadcast %c1_i32_11 : i32 to vector<16x256xi32>
    %30 = arith.shli %25, %29 : vector<16x256xi32>
    %31 = arith.ori %11, %30 : vector<16x256xi32>
    %c240_i32 = arith.constant 240 : i32
    %32 = tpu.dynamic_rotate %28 by %c240_i32 dim 1 : vector<16x256xi32>, i32 -> vector<16x256xi32>
    %c2_i32 = arith.constant 2 : i32
    %33 = vector.broadcast %c2_i32 : i32 to vector<16x256xi32>
    %34 = arith.shli %32, %33 : vector<16x256xi32>
    %35 = arith.ori %31, %34 : vector<16x256xi32>
    %c255_i32 = arith.constant 255 : i32
    %36 = tpu.dynamic_rotate %31 by %c255_i32 dim 1 : vector<16x256xi32>, i32 -> vector<16x256xi32>
    %c4_i32 = arith.constant 4 : i32
    %37 = vector.broadcast %c4_i32 : i32 to vector<16x256xi32>
    %38 = arith.shli %36, %37 : vector<16x256xi32>
    %39 = arith.ori %35, %38 : vector<16x256xi32>
    %c239_i32 = arith.constant 239 : i32
    %40 = tpu.dynamic_rotate %28 by %c239_i32 dim 1 : vector<16x256xi32>, i32 -> vector<16x256xi32>
    %c6_i32 = arith.constant 6 : i32
    %41 = vector.broadcast %c6_i32 : i32 to vector<16x256xi32>
    %42 = arith.shli %40, %41 : vector<16x256xi32>
    %43 = arith.ori %39, %42 : vector<16x256xi32>
    %44 = arith.trunci %43 : vector<16x256xi32> to vector<16x256xi8>
    %c0_12 = arith.constant 0 : index
    %c0_13 = arith.constant 0 : index
    %45 = vector.load %arg5[%c0_12, %c0_13] : memref<16x256xi8, #tpu.memory_space<vmem>>, vector<16x256xi8>
    tpu.vector_store %arg5[%c0_12, %c0_13], %44 {strides = array<i32>} : memref<16x256xi8, #tpu.memory_space<vmem>>, vector<16x256xi8>,
    return
  }
  func.func @transform_0(%arg0: i32) -> i32 {
    %c0_i32 = arith.constant 0 : i32
    %c0_i32_0 = arith.constant 0 : i32
    return %c0_i32 : i32
  }
  func.func @transform_1(%arg0: i32) -> (i32, i32) {
    %c0_i32 = arith.constant 0 : i32
    %c0_i32_0 = arith.constant 0 : i32
    return %arg0, %c0_i32 : i32, i32
  }
  func.func @transform_3(%arg0: i32) -> (i32, i32) {
    %c0_i32 = arith.constant 0 : i32
    %c0_i32_0 = arith.constant 0 : i32
    return %arg0, %c0_i32 : i32, i32
  }
  func.func @transform_4(%arg0: i32) -> (i32, i32) {
    %c0_i32 = arith.constant 0 : i32
    %c0_i32_0 = arith.constant 0 : i32
    return %arg0, %c0_i32 : i32, i32
  }
}

</mosaic_0001>

<bundles_post_ra>
// kernel: _mc_forward_impl.1
= control target key start
LH: loop header
LB: loop body
LE: loop exit
PB: predicated region body
PF: predicated region fallthrough
CT: control target
= control target key end

     0   :  { %s334_s0 = inlined_call_operand.<no memory space> [shape: f32[1], index: 0, kind: input, shape index: {}]   ;;  %s335_s1 = inlined_call_operand.vmem [shape: f32[16,256], index: 1, kind: input, shape index: {}, may-alias: {1,2}]   ;;  %s336_s2 = inlined_call_operand.vmem [shape: f32[16,256], index: 2, kind: input, shape index: {}, may-alias: {1,2}]   ;;  %s337_s3 = inlined_call_operand.vmem [shape: f32[16,256], index: 3, kind: output, shape index: {0}]   ;;  %s338_s4 = inlined_call_operand.vmem [shape: u8[16,256], index: 4, kind: output, shape index: {1}]  }
   0x1   :  { %v243_v0 = vld [vmem:[%s336_s2 + $0x17] sm:$0x1]  ;;  %v244_v1 = vld [vmem:[%s336_s2 + $0x1f] sm:$0x1] }
   0x2   :  { %42 = vst [vmem:[#allocation2] sm:$0x1] %v243_v0  ;;  %44 = vst [vmem:[#allocation2 + $0x1] sm:$0x1] %v244_v1 }
   0x3   :  { %71 = vsyncadd [#allocation3], 32  ;;  %v73_v2 = vld [vmem:[%s335_s1] sm:$0xff]  ;;  %v85_v3 = vstv %s334_s0  ;;  %v74_v4 = vld [vmem:[%s335_s1 + $0x8] sm:$0xff]  ;;  %v98_v5 = vlaneseq  ;;  %v252_v13 = vmov 0  }
   0x4   :  { %v77_v6 = vsub.f32 0.0, %v73_v2  ;;  %v78_v7 = vsub.f32 0.0, %v74_v4  ;;  %v75_v8 = vld [vmem:[%s335_s1 + $0x10] sm:$0xff]  ;;  %v76_v9 = vld [vmem:[%s335_s1 + $0x18] sm:$0xff] }
   0x5   :  { %v79_v10 = vsub.f32 0.0, %v75_v8  ;;  %v99_v11 = vshrl.u32 %v98_v5, 7  ;;  %v80_v12 = vsub.f32 0.0, %v76_v9 }
   0x6   :  { %81 = vst [vmem:[%s337_s3] sm:$0xff] %v77_v6  ;;  %vm86_vm0 = vcmp.lt.f32.partialorder %v77_v6, %v85_v3  ;;  %82 = vst [vmem:[%s337_s3 + $0x8] sm:$0xff] %v78_v7  ;;  %vm87_vm1 = vcmp.lt.f32.partialorder %v78_v7, %v85_v3 }
   0x7   :  { %v90_v14 = vsel %vm86_vm0, 1, %v252_v13  ;;  %v91_v15 = vsel %vm87_vm1, 1, %v252_v13  ;;  %83 = vst [vmem:[%s337_s3 + $0x10] sm:$0xff] %v79_v10  ;;  %vm88_vm2 = vcmp.lt.f32.partialorder %v79_v10, %v85_v3  ;;  %vm100_vm3 = vcmp.lt.s32.totalorder %v99_v11, 7  ;;  %84 = vst [vmem:[%s337_s3 + $0x18] sm:$0xff] %v80_v12 }
   0x8   :  { %v94_v16 = vrot.slane %v90_v14, 1  ;;  %v95_v17 = vrot.slane %v91_v15, 1  ;;  %v92_v18 = vsel %vm88_vm2, 1, %v252_v13  ;;  %vm89_vm4 = vcmp.lt.f32.partialorder %v80_v12, %v85_v3 }
   0x9   :  { %v96_v19 = vrot.slane %v92_v18, 1  ;;  %v93_v20 = vsel %vm89_vm4, 1, %v252_v13 }
   0xa   :  { %v97_v21 = vrot.slane %v93_v20, 1 }
   0xb   :  { %v101_v22 = vsel %vm100_vm3, %v94_v16, %v96_v19  ;;  %v103_v23 = vsel %vm100_vm3, %v96_v19, %v94_v16 }
   0xc   :  { %v102_v24 = vsel %vm100_vm3, %v95_v17, %v97_v21  ;;  %v104_v25 = vsel %vm100_vm3, %v97_v21, %v95_v17 }
   0xd   :  { %250 = dma.done.wait [#allocation3], 32 }
   0xe   :  { %251 = vsyncadd [#allocation3], 4294967264  ;;  %v127_v26 = vshll.u32 %v90_v14, 1  ;;  %v135_v27 = vshll.u32 %v101_v22, 1  ;;  %v128_v28 = vshll.u32 %v91_v15, 1  ;;  %s253_s8 = smov 112  }
   0xf   :  { %v136_v32 = vshll.u32 %v102_v24, 1  ;;  %v108_v33 = vld [vmem:[#allocation2] sm:$0x3]  ;;  %v112_v34 = vadd.s32 8, %v99_v11  ;;  %s254_s3 = smov 127   ;;  %v121_v37 = vsub.s32 1, %v99_v11 }
  0x10   :  { %v131_v29 = vor.u32 %v127_v26, %v101_v22  ;;  %v132_v30 = vor.u32 %v128_v28, %v102_v24  ;;  %v139_v31 = vor.u32 %v135_v27, %v90_v14  ;;  %v109_v36 = vsub.f32 0.0, %v108_v33  ;;  %s255_s9 = smov 111  }
  0x11   :  { %v140_v35 = vor.u32 %v136_v32, %v91_v15  ;;  %v117_v38 = vsub.s32 0, %v99_v11  ;;  %vm114_vm6 = vcmp.eq.s32.totalorder %v112_v34, 15  ;;  %v130_v40 = vshll.u32 %v93_v20, 1 }
  0x12   :  { %143 = vrot.lane.b32.xlu0 %v131_v29, %s253_s8  ;;  %147 = vrot.lane.b32.xlu1 %v132_v30, %s253_s8  ;;  %vm110_vm5 = vcmp.lt.f32.partialorder %v109_v36, %v85_v3  ;;  %v129_v43 = vshll.u32 %v92_v18, 1  ;;  %v152_v53 = vand.u32 127, %v98_v5 }
  0x13   :  { %v111_v39 = vsel %vm110_vm5, 1, %v252_v13 }
  0x14   :  { %v122_v41 = vrot.slane %v111_v39, %v121_v37  ;;  %v118_v42 = vrot.slane %v111_v39, %v117_v38  ;;  %vm153_vm7 = vcmp.lt.s32.totalorder %v152_v53, 112  ;;  %vm174_vm8 = vcmp.lt.s32.totalorder %v152_v53, 127 }
  0x15   :  { %vm195_vm9 = vcmp.lt.s32.totalorder %v152_v53, 111 }
  0x16   :  { %166 = vrot.lane.b32.xlu0 %v139_v31, %s254_s3  ;;  %v126_v44 = vsel %vm114_vm6, %v122_v41, %v104_v25  ;;  %v125_v45 = vsel %vm114_vm6, %v118_v42, %v103_v23 }
  0x17   :  { %v134_v46 = vor.u32 %v130_v40, %v126_v44  ;;  %v133_v47 = vor.u32 %v129_v43, %v125_v45  ;;  %v137_v48 = vshll.u32 %v125_v45, 1  ;;  %v138_v50 = vshll.u32 %v126_v44, 1 }
  0x19   :  { %149 = vrot.lane.b32.xlu1 %v134_v46, %s253_s8  ;;  %v141_v49 = vor.u32 %v137_v48, %v92_v18  ;;  %v142_v51 = vor.u32 %v138_v50, %v93_v20 }
  0x1a   :  { %170 = vrot.lane.b32.xlu0 %v140_v35, %s254_s3 }
  0x1d   :  { %189 = vrot.lane.b32.xlu1 %v133_v47, %s255_s9 }
  0x1e   :  { %187 = vrot.lane.b32.xlu0 %v131_v29, %s255_s9 }
  0x21   :  { %168 = vrot.lane.b32.xlu1 %v141_v49, %s254_s3 }
  0x22   :  { %145 = vrot.lane.b32.xlu0 %v133_v47, %s253_s8 }
  0x25   :  { %172 = vrot.lane.b32.xlu1 %v142_v51, %s254_s3 }
  0x26   :  { %191 = vrot.lane.b32.xlu0 %v132_v30, %s255_s9 }
  0x29   :  { %193 = vrot.lane.b32.xlu1 %v134_v46, %s255_s9 }
  0x84   :  { %v144_v52 = vpop.permute.xlu0 %143  ;;  %v148_v55 = vpop.permute.xlu1 %147 }
  0x85   :  { %v154_v57 = vsel %vm153_vm7, %v144_v52, %v148_v55  ;;  %v156_v58 = vsel %vm153_vm7, %v148_v55, %v144_v52 }
  0x86   :  { %v158_v60 = vshll.u32 %v154_v57, 2  ;;  %v159_v61 = vshll.u32 %v156_v58, 2 }
  0x88   :  { %v167_v54 = vpop.permute.xlu0 %166  ;;  %v162_v4 = vor.u32 %v158_v60, %v139_v31  ;;  %v163_v5 = vor.u32 %v159_v61, %v140_v35 }
  0x8b   :  { %v150_v62 = vpop.permute.xlu1 %149 }
  0x8c   :  { %v171_v56 = vpop.permute.xlu0 %170 }
  0x8d   :  { %v175_v63 = vsel %vm174_vm8, %v167_v54, %v171_v56  ;;  %v177_v0 = vsel %vm174_vm8, %v171_v56, %v167_v54 }
  0x8e   :  { %v179_v2 = vshll.u32 %v175_v63, 4  ;;  %v180_v3 = vshll.u32 %v177_v0, 4 }
  0x8f   :  { %v190_v6 = vpop.permute.xlu1 %189 }
  0x90   :  { %v188_v59 = vpop.permute.xlu0 %187  ;;  %v183_v8 = vor.u32 %v179_v2, %v162_v4  ;;  %v184_v9 = vor.u32 %v180_v3, %v163_v5 }
  0x93   :  { %v169_v12 = vpop.permute.xlu1 %168 }
  0x94   :  { %v146_v1 = vpop.permute.xlu0 %145 }
  0x95   :  { %v155_v13 = vsel %vm153_vm7, %v146_v1, %v150_v62  ;;  %v157_v14 = vsel %vm153_vm7, %v150_v62, %v146_v1 }
  0x96   :  { %v160_v19 = vshll.u32 %v155_v13, 2  ;;  %v161_v20 = vshll.u32 %v157_v14, 2 }
  0x97   :  { %v173_v21 = vpop.permute.xlu1 %172 }
  0x98   :  { %v192_v7 = vpop.permute.xlu0 %191  ;;  %v176_v23 = vsel %vm174_vm8, %v169_v12, %v173_v21  ;;  %v178_v24 = vsel %vm174_vm8, %v173_v21, %v169_v12  ;;  %v164_v28 = vor.u32 %v160_v19, %v141_v49  ;;  %v165_v29 = vor.u32 %v161_v20, %v142_v51 }
  0x99   :  { %v196_v10 = vsel %vm195_vm9, %v188_v59, %v192_v7  ;;  %v198_v11 = vsel %vm195_vm9, %v192_v7, %v188_v59  ;;  %v181_v25 = vshll.u32 %v176_v23, 4  ;;  %v182_v26 = vshll.u32 %v178_v24, 4 }
  0x9a   :  { %v200_v15 = vshll.u32 %v196_v10, 6  ;;  %v201_v16 = vshll.u32 %v198_v11, 6 }
  0x9b   :  { %v194_v30 = vpop.permute.xlu1 %193  ;;  %v185_v33 = vor.u32 %v181_v25, %v164_v28  ;;  %v186_v34 = vor.u32 %v182_v26, %v165_v29 }
  0x9c   :  { %v204_v17 = vor.u32 %v200_v15, %v183_v8  ;;  %v205_v18 = vor.u32 %v201_v16, %v184_v9  ;;  %v197_v31 = vsel %vm195_vm9, %v190_v6, %v194_v30  ;;  %v199_v32 = vsel %vm195_vm9, %v194_v30, %v190_v6 }
  0x9d   :  { %v202_v35 = vshll.u32 %v197_v31, 6  ;;  %v203_v36 = vshll.u32 %v199_v32, 6 }
  0x9e   :  { %v208_v22 = vpack.c.b16 %v205_v18, %v204_v17 }
  0x9f   :  { %v206_v37 = vor.u32 %v202_v35, %v185_v33  ;;  %v207_v38 = vor.u32 %v203_v36, %v186_v34 }
  0xa0   :  { %v209_v27 = vpack.c.b8 %v208_v22, %v208_v22 }
  0xa1   :  { %v210_v39 = vpack.c.b16 %v207_v38, %v206_v37 }
  0xa2   :  { %212 = vst [vmem:[%s338_s4] sm:$0xf] %v209_v27 }
  0xa3   :  { %v211_v40 = vpack.c.b8 %v210_v39, %v210_v39 }
  0xa5   :  { %213 = vst [vmem:[%s338_s4 + $0x4] sm:$0xf] %v211_v40 }
  0xa6   :  { %222 = vsyncmov [#allocation3] }
  0xa9   :  { %s223_s14 = vpop.sfrf %222 }
  0xaa   :  { %p245_p0 = scmp.ne.s32.totalorder %s223_s14, 0 }
  0xac   :  { %227 = shalt.err (%p245_p0)  }

</bundles_post_ra>
